<compile_context>
chip_gen: v7x
topology: tpu7x:2x2x1
jax: 0.10.0
libtpu: 0.0.40
codegen_flags: <defaults>
</compile_context>

<pallas_src>
import math

import jax
import jax.numpy as jnp
from jax import lax
from jax.experimental import pallas as pl
from jax.experimental.pallas import tpu as pltpu

_CLAMP_LO = 0.0005
_CLAMP_HI = 0.9995
_EPS = 1e-12                                   # torch.nn.functional.normalize default
_PAD_CELL_LOSS = -math.log1p(-_CLAMP_LO)       # exact loss of a zero-padded cell

_VMEM_TARGET = 24 * 1024 * 1024   # working-set target; headroom on v7x (64 MiB phys)
_VMEM_LIMIT = 32 * 1024 * 1024    # explicit scoped-VMEM limit (v5e default is 16 MiB)


def _round_up(x, m):
    return ((x + m - 1) // m) * m


def _vmem_estimate(tile_i, tile_j, c, in_bytes):
    """Rough per-step VMEM working set (double-buffered inputs + f32 temps)."""
    bg = 2 * tile_i * c * in_bytes            # bg block (resident across j)
    fg = 2 * tile_j * c * in_bytes            # fg block (streamed over j)
    out = 2 * tile_i * 128 * 4                # per-i accumulator block
    inv = 2 * (tile_i + tile_j) * 4           # inverse-norm vectors
    inter = 4 * tile_i * tile_j * 4           # raw / sim / loss / partial live f32
    return bg + fg + out + inv + inter


def _sim_min_loss_kernel(bg_ref, fg_ref, inv_bg_ref, inv_fg_ref, out_ref):
    """One (i, j) tile of the N x N cosine-similarity loss.

    bg_ref:     (tile_i, C)    raw bg rows for block i (resident across j)
    fg_ref:     (tile_j, C)    raw fg rows for block j (streamed)
    inv_bg_ref: (tile_i, 1)    1 / max(||bg_row||, eps) for block i
    inv_fg_ref: (1, tile_j)    1 / max(||fg_row||, eps) for block j
    out_ref:    (tile_i, 128)  lane-dense partial sums, accumulated over j.
    """
    j = pl.program_id(1)

    @pl.when(j == 0)
    def _():
        out_ref[...] = jnp.zeros_like(out_ref)

    # MXU matmul contracting the LAST dim of both operands (bg @ fg.T without
    # materializing a transposed copy).  f32 accumulation on the MXU.
    raw = lax.dot_general(
        bg_ref[...], fg_ref[...],
        dimension_numbers=(((1,), (1,)), ((), ())),
        preferred_element_type=jnp.float32)

    # Cosine similarity = raw dot rescaled by the outer product of the
    # precomputed per-row inverse norms (broadcast multiplies, no divides).
    sim = raw * inv_bg_ref[...] * inv_fg_ref[...]
    sim = jnp.clip(sim, _CLAMP_LO, _CLAMP_HI)
    # Padded rows/cols have raw == 0 -> sim clamps to _CLAMP_LO; their exact,
    # constant contribution is subtracted once in the wrapper (no mask here).
    loss = -jnp.log(1.0 - sim)
    # TODO(synk): use -jnp.log1p(-sim) (drops one VPU subtract) once log1p
    # lowering is confirmed on the deployed jaxlib; the log itself is EUP-slot
    # work either way.

    # VPU-only fold of the (tile_i, tile_j) tile into a lane-dense
    # (tile_i, 128) partial: aligned static slices + plain adds.  No XLU
    # cross-lane reduce and no scalar splat in the inner loop; the single
    # cross-lane sum happens once in the wrapper.
    tn = loss.shape[1]
    partial = loss[:, 0:128]
    for c in range(1, tn // 128):
        partial = partial + loss[:, c * 128:(c + 1) * 128]
    out_ref[...] += partial


def sim_min_loss(embedded_bg, embedded_fg, *, tile_i=None, tile_j=None):
    """Pallas implementation of SimMinLoss(metric='cos', reduction='mean').

    Args:
      embedded_bg: [N, C] array.
      embedded_fg: [N, C] array.
      tile_i: optional bg-row tile (multiple of 8).  Auto-selected if None.
      tile_j: optional fg-row tile (multiple of 128).  Auto-selected if None.
    Returns:
      scalar f32 loss.
    """
    N, C = embedded_bg.shape
    assert embedded_fg.shape == (N, C)
    itemsize = jnp.dtype(embedded_bg.dtype).itemsize

    # Per-row inverse norms in f32: rsqrt(max(sumsq, eps^2)) == 1/max(||x||, eps),
    # matching F.normalize's denominator.  Tiny [N]-sized reductions; the raw
    # inputs stay un-normalized so the MXU sees the original dtype and no
    # per-element divide or normalized input copy is needed.
    bg32 = embedded_bg.astype(jnp.float32)
    fg32 = embedded_fg.astype(jnp.float32)
    eps_sq = jnp.float32(_EPS) * jnp.float32(_EPS)
    inv_bg = lax.rsqrt(
        jnp.maximum(jnp.sum(bg32 * bg32, axis=1, keepdims=True), eps_sq))   # (N, 1)
    inv_fg = lax.rsqrt(
        jnp.maximum(jnp.sum(fg32 * fg32, axis=1), eps_sq)).reshape(1, N)    # (1, N)

    # ---- tile geometry -----------------------------------------------------
    if tile_j is None:
        tile_j = min(256, _round_up(N, 128))
    assert tile_j % 128 == 0, "tile_j must be a multiple of 128"

    rows8 = _round_up(N, 8)
    if tile_i is None:
        # Grow bg blocks toward the VMEM budget: bg is fetched once per i and
        # stays resident across the whole j loop, so bigger tile_i halves fg
        # HBM re-reads and grid-step count.
        tile_i = 512
        while tile_i > 8 and _vmem_estimate(tile_i, tile_j, C, itemsize) > _VMEM_TARGET:
            tile_i //= 2
        # Keep grid_i >= 2 whenever N allows it so the second v7x TensorCore
        # gets work from the "parallel" i axis.
        if rows8 > 8:
            tile_i = min(tile_i, _round_up((rows8 + 1) // 2, 8))
        tile_i = min(tile_i, rows8)
    assert tile_i % 8 == 0, "tile_i must be a multiple of 8"

    n_pad_i = _round_up(N, tile_i)
    n_pad_j = _round_up(N, tile_j)
    grid_i = n_pad_i // tile_i
    grid_j = n_pad_j // tile_j

    # Row-only zero padding.  C stays unpadded (a block dim equal to the full
    # array dim is legal; Mosaic handles lane padding per tile), so when N is
    # already tile-aligned no HBM pad copies are made at all.
    bg_in, inv_bg_in = embedded_bg, inv_bg
    if n_pad_i != N:
        bg_in = jnp.pad(embedded_bg, ((0, n_pad_i - N), (0, 0)))
        inv_bg_in = jnp.pad(inv_bg, ((0, n_pad_i - N), (0, 0)))
    fg_in, inv_fg_in = embedded_fg, inv_fg
    if n_pad_j != N:
        fg_in = jnp.pad(embedded_fg, ((0, n_pad_j - N), (0, 0)))
        inv_fg_in = jnp.pad(inv_fg, ((0, 0), (0, n_pad_j - N)))

    partials = pl.pallas_call(
        _sim_min_loss_kernel,
        out_shape=jax.ShapeDtypeStruct((n_pad_i, 128), jnp.float32),
        grid_spec=pltpu.PrefetchScalarGridSpec(
            num_scalar_prefetch=0,
            grid=(grid_i, grid_j),
            in_specs=[
                pl.BlockSpec((tile_i, C), lambda i, j: (i, 0)),   # bg rows, block i
                pl.BlockSpec((tile_j, C), lambda i, j: (j, 0)),   # fg rows, block j
                pl.BlockSpec((tile_i, 1), lambda i, j: (i, 0)),   # inv_bg, block i
                pl.BlockSpec((1, tile_j), lambda i, j: (0, j)),   # inv_fg, block j
            ],
            out_specs=pl.BlockSpec((tile_i, 128), lambda i, j: (i, 0)),
        ),
        compiler_params=pltpu.CompilerParams(
            dimension_semantics=("parallel", "arbitrary"),
            vmem_limit_bytes=_VMEM_LIMIT),
    )(bg_in, fg_in, inv_bg_in, inv_fg_in)

    # The un-masked kernel sum includes every padded row/col cell; each such
    # cell contributes exactly -log1p(-CLAMP_LO) (raw == 0 clamps to the
    # floor), so subtract that closed form.  Mean = sum * 1/(N*N) (constant
    # multiply, never a divide).
    pad_cells = n_pad_i * n_pad_j - N * N
    total = jnp.sum(partials) - jnp.float32(pad_cells * _PAD_CELL_LOSS)
    return total * jnp.float32(1.0 / (N * N))


def _reference_sim_min_loss(embedded_bg, embedded_fg):
    # Pure-JAX mirror of the PyTorch code (normalize -> matmul -> clamp -> log).
    bg = embedded_bg.astype(jnp.float32)
    fg = embedded_fg.astype(jnp.float32)
    bg_n = bg / jnp.maximum(jnp.linalg.norm(bg, axis=1, keepdims=True), _EPS)
    fg_n = fg / jnp.maximum(jnp.linalg.norm(fg, axis=1, keepdims=True), _EPS)
    sim = jnp.clip(bg_n @ fg_n.T, _CLAMP_LO, _CLAMP_HI)
    return jnp.mean(-jnp.log(1.0 - sim))


if __name__ == "__main__":
    key = jax.random.PRNGKey(0)
    k1, k2, k3, k4 = jax.random.split(key, 4)

    # Case 1: tiny aligned-rows shape (single i block, fg padded to one 128 block).
    bg_a = jax.random.normal(k1, (8, 32), dtype=jnp.float32)
    fg_a = jax.random.normal(k2, (8, 32), dtype=jnp.float32)
    got_a = jax.block_until_ready(sim_min_loss(bg_a, fg_a))
    ref_a = jax.block_until_ready(_reference_sim_min_loss(bg_a, fg_a))
    assert jnp.allclose(got_a, ref_a, rtol=1e-5, atol=1e-5), (got_a, ref_a)

    # Case 2: unaligned N and C with auto tiles — exercises row padding, the
    # wrapper-side padded-cell correction, and a grid_i >= 2 "parallel" axis.
    bg_b = jax.random.normal(k3, (200, 48), dtype=jnp.float32)
    fg_b = jax.random.normal(k4, (200, 48), dtype=jnp.float32)
    got_b = jax.block_until_ready(sim_min_loss(bg_b, fg_b))
    ref_b = jax.block_until_ready(_reference_sim_min_loss(bg_b, fg_b))
    assert jnp.allclose(got_b, ref_b, rtol=1e-5, atol=1e-5), (got_b, ref_b)

    # Case 3: explicit small tiles — exercises cross-tile accumulation over the
    # j (reduction) axis and the multi-chunk lane fold.
    got_c = jax.block_until_ready(sim_min_loss(bg_b, fg_b, tile_i=64, tile_j=128))
    assert jnp.allclose(got_c, ref_b, rtol=1e-5, atol=1e-5), (got_c, ref_b)

    print("KERNEL_OK")
</pallas_src>

<mosaic_0001>
module attributes {stable_mosaic.version = 11 : i64} {
  func.func @_sim_min_loss_kernel(%arg0: i32, %arg1: i32, %arg2: memref<8x32xf32, #tpu.memory_space<vmem>>, %arg3: memref<128x32xf32, #tpu.memory_space<vmem>>, %arg4: memref<8x1xf32, #tpu.memory_space<vmem>>, %arg5: memref<1x128xf32, #tpu.memory_space<vmem>>, %arg6: memref<8x128xf32, #tpu.memory_space<vmem>>) attributes {dimension_semantics = [#tpu.dimension_semantics<parallel>, #tpu.dimension_semantics<arbitrary>], iteration_bounds = array<i64: 1, 1>, scalar_prefetch = 0 : i64, scratch_operands = 0 : i64, tpu.core_type = #tpu.core_type<tc>, window_params = [{transform_indices = @transform_0, window_bounds = array<i64: 8, 32>}, {transform_indices = @transform_1, window_bounds = array<i64: 128, 32>}, {transform_indices = @transform_2, window_bounds = array<i64: 8, 1>}, {transform_indices = @transform_3, window_bounds = array<i64: 1, 128>}, {transform_indices = @transform_4, window_bounds = array<i64: 8, 128>}]} {
    %c0_i32 = arith.constant 0 : i32
    %0 = arith.cmpi eq, %arg1, %c0_i32 : i32
    %1 = arith.extui %0 : i1 to i32
    %c0_i32_0 = arith.constant 0 : i32
    %2 = arith.cmpi ne, %1, %c0_i32_0 : i32
    scf.if %2 {
      %cst_16 = arith.constant 0.000000e+00 : f32
      %24 = vector.broadcast %cst_16 : f32 to vector<8x128xf32>
      %c0_17 = arith.constant 0 : index
      %c0_18 = arith.constant 0 : index
      %25 = vector.load %arg6[%c0_17, %c0_18] : memref<8x128xf32, #tpu.memory_space<vmem>>, vector<8x128xf32>
      tpu.vector_store %arg6[%c0_17, %c0_18], %24 {strides = array<i32>} : memref<8x128xf32, #tpu.memory_space<vmem>>, vector<8x128xf32>,
    } else {
    }
    %c0 = arith.constant 0 : index
    %c0_1 = arith.constant 0 : index
    %3 = vector.load %arg2[%c0, %c0_1] : memref<8x32xf32, #tpu.memory_space<vmem>>, vector<8x32xf32>
    %c0_2 = arith.constant 0 : index
    %c0_3 = arith.constant 0 : index
    %4 = vector.load %arg3[%c0_2, %c0_3] : memref<128x32xf32, #tpu.memory_space<vmem>>, vector<128x32xf32>
    %cst = arith.constant dense<0.000000e+00> : vector<8x128xf32>
    %5 = tpu.matmul %3, %4, %cst {dimension_numbers = #tpu.dot_dimension_numbers<[1], [1], [0], [0], [0, 0, 1, 0], [], []>} : vector<8x32xf32>, vector<128x32xf32>, vector<8x128xf32> -> vector<8x128xf32>
    %c0_4 = arith.constant 0 : index
    %c0_5 = arith.constant 0 : index
    %6 = vector.load %arg4[%c0_4, %c0_5] : memref<8x1xf32, #tpu.memory_space<vmem>>, vector<8x1xf32>
    %7 = vector.broadcast %6 : vector<8x1xf32> to vector<8x128xf32>
    %8 = arith.mulf %5, %7 : vector<8x128xf32>
    %c0_6 = arith.constant 0 : index
    %c0_7 = arith.constant 0 : index
    %9 = vector.load %arg5[%c0_6, %c0_7] : memref<1x128xf32, #tpu.memory_space<vmem>>, vector<1x128xf32>
    %10 = vector.broadcast %9 : vector<1x128xf32> to vector<8x128xf32>
    %11 = arith.mulf %8, %10 : vector<8x128xf32>
    %cst_8 = arith.constant 5.000000e-04 : f32
    %cst_9 = arith.constant 0.999499976 : f32
    %12 = vector.broadcast %cst_8 : f32 to vector<8x128xf32>
    %13 = arith.maximumf %12, %11 : vector<8x128xf32>
    %14 = vector.broadcast %cst_9 : f32 to vector<8x128xf32>
    %15 = arith.minimumf %14, %13 : vector<8x128xf32>
    %cst_10 = arith.constant 1.000000e+00 : f32
    %16 = vector.broadcast %cst_10 : f32 to vector<8x128xf32>
    %17 = arith.subf %16, %15 : vector<8x128xf32>
    %18 = math.log %17 : vector<8x128xf32>
    %cst_11 = arith.constant 0.000000e+00 : f32
    %19 = vector.broadcast %cst_11 : f32 to vector<8x128xf32>
    %20 = arith.subf %19, %18 : vector<8x128xf32>
    %c0_12 = arith.constant 0 : index
    %c0_13 = arith.constant 0 : index
    %21 = vector.load %arg6[%c0_12, %c0_13] : memref<8x128xf32, #tpu.memory_space<vmem>>, vector<8x128xf32>
    %22 = arith.addf %21, %20 : vector<8x128xf32>
    %c0_14 = arith.constant 0 : index
    %c0_15 = arith.constant 0 : index
    %23 = vector.load %arg6[%c0_14, %c0_15] : memref<8x128xf32, #tpu.memory_space<vmem>>, vector<8x128xf32>
    tpu.vector_store %arg6[%c0_14, %c0_15], %22 {strides = array<i32>} : memref<8x128xf32, #tpu.memory_space<vmem>>, vector<8x128xf32>,
    return
  }
  func.func @transform_0(%arg0: i32, %arg1: i32) -> (i32, i32) {
    %c0_i32 = arith.constant 0 : i32
    %c0_i32_0 = arith.constant 0 : i32
    return %arg0, %c0_i32 : i32, i32
  }
  func.func @transform_1(%arg0: i32, %arg1: i32) -> (i32, i32) {
    %c0_i32 = arith.constant 0 : i32
    %c0_i32_0 = arith.constant 0 : i32
    return %arg1, %c0_i32 : i32, i32
  }
  func.func @transform_2(%arg0: i32, %arg1: i32) -> (i32, i32) {
    %c0_i32 = arith.constant 0 : i32
    %c0_i32_0 = arith.constant 0 : i32
    return %arg0, %c0_i32 : i32, i32
  }
  func.func @transform_3(%arg0: i32, %arg1: i32) -> (i32, i32) {
    %c0_i32 = arith.constant 0 : i32
    %c0_i32_0 = arith.constant 0 : i32
    return %c0_i32, %arg1 : i32, i32
  }
  func.func @transform_4(%arg0: i32, %arg1: i32) -> (i32, i32) {
    %c0_i32 = arith.constant 0 : i32
    %c0_i32_0 = arith.constant 0 : i32
    return %arg0, %c0_i32 : i32, i32
  }
}

</mosaic_0001>

<bundles_post_ra>
// kernel: tpu_custom_call.1
= control target key start
LH: loop header
LB: loop body
LE: loop exit
PB: predicated region body
PF: predicated region fallthrough
CT: control target
= control target key end

     0   :  { %vm40_vm0 = vcmask 261120   ;;  %v334_v2 = vmov 0.0|0.0   ;;  %vm335_vm2 = vmmov 0   ;;  %v336_v5 = vmov 0.0   ;;  %s456_s0 = inlined_call_operand.vmem [shape: f32[8,32], index: 0, kind: input, shape index: {}]   ;;  %s457_s1 = inlined_call_operand.vmem [shape: f32[128,32], index: 1, kind: input, shape index: {}]   ;;  %s458_s2 = inlined_call_operand.vmem [shape: f32[8,1], index: 2, kind: input, shape index: {}]   ;;  %s459_s3 = inlined_call_operand.vmem [shape: f32[1,128], index: 3, kind: input, shape index: {}]   ;;  %s460_s4 = inlined_call_operand.hbm [shape: f32[8,128], index: 4, kind: output, shape index: {}]  }
   0x1   :  { %v24_v0 = vld [vmem:[%s457_s1] sm:$0xff]  ;;  %v25_v1 = vld [vmem:[%s457_s1 + $0x8] sm:$0xff]  ;;  %270 = vmatprep.subr.bf16.mxu0 %v334_v2  ;;  %vm372_vm1 = vmpackc.low %vm40_vm0, %vm40_vm0  ;;  %267 = vmatprep.mubr.msk.f32.mxu0 %vm335_vm2, %v336_v5  ;;  %v337_v6 = vmov 0  }
   0x2   :  { %v271_v3 = vpack.c.bf16 %v25_v1, %v24_v0  ;;  %307 = vset.pattern.permute.xlu0 %v337_v6  ;;  %v26_v7 = vld [vmem:[%s457_s1 + $0x10] sm:$0xff]  ;;  %v27_v8 = vld [vmem:[%s457_s1 + $0x18] sm:$0xff]  ;;  %v162_v9 = vld [vmem:[%s458_s2] sm:$0xff] }
   0x4   :  { %273 = vmatpush3.bf16.xpose.msk.msra.mxu0 %vm372_vm1, %v271_v3 }
   0x5   :  { %274 = vmatprep.subr.bf16.mxu0 %v334_v2 }
   0x6   :  { %9 = vsyncpa [#allocation3], 0  ;;  %v275_v10 = vpack.c.bf16 %v27_v8, %v26_v7  ;;  %165 = vperm.xlu0 %307, %v162_v9   ;;  %v28_v11 = vld [vmem:[%s457_s1 + $0x20] sm:$0xff]  ;;  %v29_v12 = vld [vmem:[%s457_s1 + $0x28] sm:$0xff] }
   0x7   :  { %v279_v13 = vpack.c.bf16 %v29_v12, %v28_v11  ;;  %v30_v14 = vld [vmem:[%s457_s1 + $0x30] sm:$0xff]  ;;  %v31_v15 = vld [vmem:[%s457_s1 + $0x38] sm:$0xff]  ;;  %v32_v17 = vld [vmem:[%s457_s1 + $0x40] sm:$0xff] }
   0x8   :  { %v283_v16 = vpack.c.bf16 %v31_v15, %v30_v14  ;;  %v33_v18 = vld [vmem:[%s457_s1 + $0x48] sm:$0xff]  ;;  %v34_v20 = vld [vmem:[%s457_s1 + $0x50] sm:$0xff]  ;;  %v35_v21 = vld [vmem:[%s457_s1 + $0x58] sm:$0xff] }
   0x9   :  { %v287_v19 = vpack.c.bf16 %v33_v18, %v32_v17  ;;  %v291_v22 = vpack.c.bf16 %v35_v21, %v34_v20  ;;  %v36_v23 = vld [vmem:[%s457_s1 + $0x60] sm:$0xff]  ;;  %v37_v24 = vld [vmem:[%s457_s1 + $0x68] sm:$0xff]  ;;  %v38_v26 = vld [vmem:[%s457_s1 + $0x70] sm:$0xff] }
   0xa   :  { %v295_v25 = vpack.c.bf16 %v37_v24, %v36_v23  ;;  %v39_v27 = vld [vmem:[%s457_s1 + $0x78] sm:$0xff]  ;;  %v23_v29 = vld [vmem:[%s456_s0] sm:$0xff]  ;;  %s338_s1 = smov [#allocation2]  }
   0xb   :  { %v299_v28 = vpack.c.bf16 %v39_v27, %v38_v26  ;;  %v217_v32 = vld [vmem:[%s459_s3] ss:$0 sm:$0xff]  ;;  %s192_s26 = sshll.u32 %s338_s1, 4  ;;  %s193_s26 = int_to_ptr.vmem [resolvable:$true] %s192_s26 }
   0xc   :  { %277 = vmatpush3.bf16.xpose.msk.msra.mxu0 %vm372_vm1, %v275_v10  ;;  %s310_s0 = scalar_lea.vmem %s193_s26, 128  ;;  %p315_p1 = scmp.lt.s32.totalorder %s193_s26, %s193_s26 }
   0xd   :  { %278 = vmatprep.subr.bf16.mxu0 %v334_v2  ;;  %p311_p0 = scmp.ne.s32.totalorder %s193_s26, %s310_s0  ;;  %p316_p2 = scmp.lt.s32.totalorder %s310_s0, %s310_s0 }
   0xf   :  { %p317_p3 = por %p316_p2, %p315_p1 }
  0x11   :  { %p318_p4 = pnand %p317_p3, %p311_p0 }
  0x14   :  { %281 = vmatpush3.bf16.xpose.msk.msra.mxu0 %vm372_vm1, %v279_v13 }
  0x15   :  { %282 = vmatprep.subr.bf16.mxu0 %v334_v2 }
  0x1c   :  { %285 = vmatpush3.bf16.xpose.msk.msra.mxu0 %vm372_vm1, %v283_v16 }
  0x1d   :  { %286 = vmatprep.subr.bf16.mxu0 %v334_v2 }
  0x24   :  { %289 = vmatpush3.bf16.xpose.msk.msra.mxu0 %vm372_vm1, %v287_v19 }
  0x25   :  { %290 = vmatprep.subr.bf16.mxu0 %v334_v2 }
  0x2c   :  { %293 = vmatpush3.bf16.xpose.msk.msra.mxu0 %vm372_vm1, %v291_v22 }
  0x2d   :  { %294 = vmatprep.subr.bf16.mxu0 %v334_v2 }
  0x34   :  { %297 = vmatpush3.bf16.xpose.msk.msra.mxu0 %vm372_vm1, %v295_v25 }
  0x35   :  { %298 = vmatprep.subr.bf16.mxu0 %v334_v2 }
  0x3c   :  { %301 = vmatpush3.bf16.xpose.msk.msra.mxu0 %vm372_vm1, %v299_v28 }
  0x43   :  { %268 = vmatmul.mubr.msk.f32.vlgmr.msra.gmra.mrb[0].mxu0 %vm40_vm0, %v23_v29 }
  0x85   :  { %v166_v30 = vpop.permute.xlu0 %165 }
 0x116   :  { %v158_v31 = vpop.f32.mrb[0].mxu0 }
 0x117   :  { %v168_v33 = vmul.f32 %v166_v30, %v158_v31  ;;  %v269_v34 = vpop.f32.mrb[1].mxu0 }
 0x119   :  { %v176_v35 = vmul.f32 %v217_v32, %v168_v33 }
 0x11b   :  { %v177_v36 = vmax.f32 %v176_v35, 0.0005 }
 0x11d   :  { %v178_v37 = vmin.f32 %v177_v36, 0.9995 }
 0x11f   :  { %v179_v38 = vsub.f32 1.0, %v178_v37 }
 0x121   :  { %308 = vlog2.f32 %v179_v38 }
 0x12b   :  { %v309_v39 = vpop.eup %308 }
 0x12c   :  { %v181_v40 = vmul.f32 0.6931472, %v309_v39 }
 0x12e   :  { %v182_v41 = vsub.f32 0.0, %v181_v40 }
 0x130   :  { %185 = vst [vmem:[#allocation2] sm:$0xff] %v182_v41 }
 0x131   :  { %321 = shalt.err (!%p318_p4)
}
 0x132   :  { %s322_s28 = scalar_lea.hbm %s460_s4, 128 }
 0x133   :  { %p323_p5 = scmp.ne.s32.totalorder %s460_s4, %s322_s28  ;;  %p326_p6 = scmp.lt.u32.totalorder %s322_s28, %s460_s4 }
 0x135   :  { %p328_p7 = pnand %p326_p6, %p323_p5 }
 0x137   :  { %331 = shalt.err (!%p328_p7)
}
 0x138   :  { %195 = dma.vmem_to_hbm [thread:$0]  %s193_s26, 128, %s460_s4, [#allocation3]  }
 0x139   :  { %332 = dma.done.wait [#allocation3], 128  }
 0x13a   :  { %333 = vsyncadd [#allocation3], 4294967168 }
 0x13b   :  { %199 = vsyncpa [#allocation3], 1 }

</bundles_post_ra>
